<compile_context>
chip_gen: v7x
topology: tpu7x:2x2x1
jax: 0.10.0
libtpu: 0.0.40
codegen_flags: <defaults>
</compile_context>

<pallas_src>
import functools

import jax
import jax.numpy as jnp
from jax import lax
from jax.experimental import pallas as pl
from jax.experimental.pallas import tpu as pltpu

BN_EPS = 1e-5
_MIB = 1024 * 1024


# ---------------------------------------------------------------------------
# Generation-aware configuration
# ---------------------------------------------------------------------------
def _tpu_config():
    """Pick VMEM budget and tile preferences per TPU generation."""
    vmem_cap = None
    try:
        info = pltpu.get_tpu_info()
        vmem_cap = getattr(info, "vmem_capacity_bytes", None)
    except Exception:
        vmem_cap = None
    if vmem_cap is None or vmem_cap < 96 * _MIB:
        # v7x (64 MiB VMEM per TC) or unknown: stay conservative.
        return dict(vmem_limit=52 * _MIB, tn_pref=512, tk_pref=512,
                    td_pref=1024, tb_pref=4096)
    # v5e / v6e (128 MiB VMEM): big tiles cut HBM re-streaming of activations.
    return dict(vmem_limit=100 * _MIB, tn_pref=2048, tk_pref=512,
                td_pref=2048, tb_pref=4096)


def _pick_tile(dim, preferred, align):
    """Largest tile t with t | dim, t % align == 0, t <= preferred.
    Falls back to the full dim (always a legal full-extent block) when the dim
    is small or not align-divisible."""
    dim, preferred, align = int(dim), int(preferred), int(align)
    if dim <= preferred:
        return dim
    if dim % align != 0:
        return dim
    best = align
    t = align
    while t <= preferred:
        if dim % t == 0:
            best = t
        t += align
    return best


def _linear_vmem_estimate(rows, tn, tk, itemsize):
    return (rows * tn * 4                 # fp32 accumulator scratch
            + 2 * rows * tk * itemsize    # x double-buffer
            + 2 * tk * tn * itemsize      # w double-buffer
            + 2 * rows * tn * itemsize    # output double-buffer(s)
            + 8 * tn * 4)                 # g / b blocks


def _fit_linear_tiles(rows, N, K, itemsize, cfg):
    tn = _pick_tile(N, cfg["tn_pref"], 128)
    tk = _pick_tile(K, cfg["tk_pref"], 128)
    budget = int(cfg["vmem_limit"] * 0.9)
    while _linear_vmem_estimate(rows, tn, tk, itemsize) > budget and tn % 256 == 0:
        tn //= 2
    while _linear_vmem_estimate(rows, tn, tk, itemsize) > budget and tk % 256 == 0:
        tk //= 2
    return tn, tk


# ---------------------------------------------------------------------------
# Projector layer kernels
# ---------------------------------------------------------------------------
def _linear_bn_relu_kernel(x_ref, w_ref, g_ref, b_ref, o_ref, acc_ref, *, batch):
    """Linear(no bias) -> BatchNorm1d(affine) -> ReLU, both views stacked on rows.
    BN statistics stay per-view via static row slices of the resident acc tile."""
    k = pl.program_id(1)

    @pl.when(k == 0)
    def _():
        acc_ref[...] = jnp.zeros_like(acc_ref)

    acc_ref[...] += jnp.dot(x_ref[...], w_ref[...],
                            preferred_element_type=jnp.float32)

    @pl.when(k == pl.num_programs(1) - 1)
    def _():
        g = g_ref[...].astype(jnp.float32)      # (1, tn)
        b = b_ref[...].astype(jnp.float32)
        inv_b = jnp.float32(1.0 / batch)

        def bn_relu_store(row0):
            hv = acc_ref[pl.ds(row0, batch), :]              # (B, tn) fp32
            mu = jnp.sum(hv, axis=0, keepdims=True) * inv_b
            ex2 = jnp.sum(hv * hv, axis=0, keepdims=True) * inv_b
            var = jnp.maximum(ex2 - mu * mu, 0.0)            # clamp cancellation
            scale = g * lax.rsqrt(var + BN_EPS)
            shift = b - mu * scale
            o_ref[pl.ds(row0, batch), :] = jnp.maximum(
                hv * scale + shift, 0.0).astype(o_ref.dtype)

        bn_relu_store(0)        # view 1
        bn_relu_store(batch)    # view 2


def _final_linear_bn_kernel(x_ref, w_ref, z1_ref, z2_ref, acc_ref, *, batch):
    """Final Linear (no BN/ReLU in the projector) fused with the loss-side
    affine-free BatchNorm; the 1/batch of `c /= B` is folded into z1's scale."""
    k = pl.program_id(1)

    @pl.when(k == 0)
    def _():
        acc_ref[...] = jnp.zeros_like(acc_ref)

    acc_ref[...] += jnp.dot(x_ref[...], w_ref[...],
                            preferred_element_type=jnp.float32)

    @pl.when(k == pl.num_programs(1) - 1)
    def _():
        inv_b = jnp.float32(1.0 / batch)

        def bn_store(row0, out_ref, extra_scale):
            zv = acc_ref[pl.ds(row0, batch), :]              # (B, tn) fp32
            mu = jnp.sum(zv, axis=0, keepdims=True) * inv_b
            ex2 = jnp.sum(zv * zv, axis=0, keepdims=True) * inv_b
            var = jnp.maximum(ex2 - mu * mu, 0.0)
            out_ref[...] = ((zv - mu) * (lax.rsqrt(var + BN_EPS) * extra_scale)
                            ).astype(out_ref.dtype)

        bn_store(0, z1_ref, inv_b)                 # 1/B folded into z1's scale
        bn_store(batch, z2_ref, jnp.float32(1.0))


def _run_linear_bn_relu(x, w, g, b, *, batch, cfg):
    rows, K = x.shape
    N = w.shape[1]
    itemsize = jnp.dtype(x.dtype).itemsize
    tn, tk = _fit_linear_tiles(rows, N, K, itemsize, cfg)
    grid = (N // tn, K // tk)
    kernel = functools.partial(_linear_bn_relu_kernel, batch=batch)
    return pl.pallas_call(
        kernel,
        out_shape=jax.ShapeDtypeStruct((rows, N), x.dtype),
        grid=grid,
        in_specs=[
            pl.BlockSpec((rows, tk), lambda j, k: (0, k)),
            pl.BlockSpec((tk, tn), lambda j, k: (k, j)),
            pl.BlockSpec((1, tn), lambda j, k: (0, j)),
            pl.BlockSpec((1, tn), lambda j, k: (0, j)),
        ],
        out_specs=pl.BlockSpec((rows, tn), lambda j, k: (0, j)),
        scratch_shapes=[pltpu.VMEM((rows, tn), jnp.float32)],
        compiler_params=pltpu.CompilerParams(
            dimension_semantics=("parallel", "arbitrary"),
            vmem_limit_bytes=cfg["vmem_limit"]),
    )(x, w, g, b)


def _run_final_linear_bn(x, w, *, batch, cfg):
    rows, K = x.shape
    N = w.shape[1]
    itemsize = jnp.dtype(x.dtype).itemsize
    tn, tk = _fit_linear_tiles(rows, N, K, itemsize, cfg)
    grid = (N // tn, K // tk)
    kernel = functools.partial(_final_linear_bn_kernel, batch=batch)
    return pl.pallas_call(
        kernel,
        out_shape=(jax.ShapeDtypeStruct((batch, N), x.dtype),
                   jax.ShapeDtypeStruct((batch, N), x.dtype)),
        grid=grid,
        in_specs=[
            pl.BlockSpec((rows, tk), lambda j, k: (0, k)),
            pl.BlockSpec((tk, tn), lambda j, k: (k, j)),
        ],
        out_specs=(pl.BlockSpec((batch, tn), lambda j, k: (0, j)),
                   pl.BlockSpec((batch, tn), lambda j, k: (0, j))),
        scratch_shapes=[pltpu.VMEM((rows, tn), jnp.float32)],
        compiler_params=pltpu.CompilerParams(
            dimension_semantics=("parallel", "arbitrary"),
            vmem_limit_bytes=cfg["vmem_limit"]),
    )(x, w)


def run_projector(lat1, lat2, params, *, compute_dtype=jnp.float32, cfg=None):
    """Both views stacked on the row axis so projector weights are streamed
    from HBM once per layer for the two views; BN stats remain per-view."""
    cfg = cfg or _tpu_config()
    batch = lat1.shape[0]
    # Cast once: stacked activations + weights to the MXU compute dtype.
    x = jnp.concatenate([lat1, lat2], axis=0).astype(compute_dtype)   # (2B, D0)
    w1 = params["w1"].astype(compute_dtype)
    w2 = params["w2"].astype(compute_dtype)
    w3 = params["w3"].astype(compute_dtype)
    g1 = params["g1"].astype(jnp.float32)
    b1 = params["b1"].astype(jnp.float32)
    g2 = params["g2"].astype(jnp.float32)
    b2 = params["b2"].astype(jnp.float32)

    h = _run_linear_bn_relu(x, w1, g1, b1, batch=batch, cfg=cfg)
    h = _run_linear_bn_relu(h, w2, g2, b2, batch=batch, cfg=cfg)
    z1n, z2n = _run_final_linear_bn(h, w3, batch=batch, cfg=cfg)
    return z1n, z2n


# ---------------------------------------------------------------------------
# Streaming Barlow loss kernel (never materializes the full DxD matrix).
# i axis is "parallel" (megacore on v7x): each i accumulates its partial
# sum(c^2) / sum(diag) / sum(diag^2) rows directly in its output blocks; the
# tiny final reduction + scalar loss assembly happens in the JAX wrapper.
# ---------------------------------------------------------------------------
def _barlow_partial_kernel(z1_ref, z2_ref, c2_ref, d1_ref, d2_ref, c_acc_ref):
    i, j, kb = pl.program_id(0), pl.program_id(1), pl.program_id(2)
    nb = pl.num_programs(2)

    @pl.when((j == 0) & (kb == 0))
    def _():
        c2_ref[...] = jnp.zeros_like(c2_ref)
        d1_ref[...] = jnp.zeros_like(d1_ref)
        d2_ref[...] = jnp.zeros_like(d2_ref)

    @pl.when(kb == 0)
    def _():
        c_acc_ref[...] = jnp.zeros_like(c_acc_ref)

    # c_blk += z1n[batch_tile, i_tile].T @ z2n[batch_tile, j_tile]
    # (1/batch is already folded into z1n's normalization scale)
    c_acc_ref[...] += lax.dot_general(
        z1_ref[...], z2_ref[...], (((0,), (0,)), ((), ())),
        preferred_element_type=jnp.float32)

    @pl.when(kb == nb - 1)
    def _():
        c = c_acc_ref[...]                                   # (td, td) fp32
        c2_ref[...] += jnp.sum(c * c, axis=0, keepdims=True)

        @pl.when(i == j)
        def _():
            td = c.shape[0]
            row = lax.broadcasted_iota(jnp.int32, (td, td), 0)
            col = lax.broadcasted_iota(jnp.int32, (td, td), 1)
            cd = jnp.where(row == col, c, 0.0)
            d1_ref[...] += jnp.sum(cd, axis=0, keepdims=True)
            d2_ref[...] += jnp.sum(cd * cd, axis=0, keepdims=True)


def run_barlow_loss(z1n, z2n, lambd, *, cfg=None):
    cfg = cfg or _tpu_config()
    B, D = z1n.shape
    itemsize = jnp.dtype(z1n.dtype).itemsize
    sub_align = 8 if itemsize == 4 else 16
    td = _pick_tile(D, cfg["td_pref"], 128)
    tb = _pick_tile(B, cfg["tb_pref"], sub_align)     # usually the full batch
    budget = int(cfg["vmem_limit"] * 0.9)

    def est(td_):
        return (td_ * td_ * 4                 # c accumulator scratch
                + 4 * tb * td_ * itemsize     # z1/z2 double-buffers
                + 6 * td_ * 4)                # partial-row outputs

    while est(td) > budget and td % 256 == 0:
        td //= 2

    grid = (D // td, D // td, B // tb)
    c2, d1, d2 = pl.pallas_call(
        _barlow_partial_kernel,
        out_shape=(jax.ShapeDtypeStruct((1, D), jnp.float32),
                   jax.ShapeDtypeStruct((1, D), jnp.float32),
                   jax.ShapeDtypeStruct((1, D), jnp.float32)),
        grid=grid,
        in_specs=[
            pl.BlockSpec((tb, td), lambda i, j, kb: (kb, i)),
            pl.BlockSpec((tb, td), lambda i, j, kb: (kb, j)),
        ],
        out_specs=(pl.BlockSpec((1, td), lambda i, j, kb: (0, i)),
                   pl.BlockSpec((1, td), lambda i, j, kb: (0, i)),
                   pl.BlockSpec((1, td), lambda i, j, kb: (0, i))),
        scratch_shapes=[pltpu.VMEM((td, td), jnp.float32)],
        compiler_params=pltpu.CompilerParams(
            dimension_semantics=("parallel", "arbitrary", "arbitrary"),
            vmem_limit_bytes=cfg["vmem_limit"]),
    )(z1n, z2n)

    sum_c2 = jnp.sum(c2)
    sum_d = jnp.sum(d1)
    sum_d2 = jnp.sum(d2)
    # on_diag = sum_d2 - 2*sum_d + D ;  off_diag = sum_c2 - sum_d2
    return (sum_d2 - 2.0 * sum_d + jnp.float32(D)
            + jnp.float32(lambd) * (sum_c2 - sum_d2))


# ---------------------------------------------------------------------------
# Synthetic backbone (stand-in for the external MAE/ViT encoder module)
# ---------------------------------------------------------------------------
def backbone_forward(y, w_embed, cls_token, mask_ratio=0.0, patch=4):
    # TODO(synk): the real backbone is an external MAE encoder (with masking);
    # here a deterministic patch-embedding + cls token stand-in is used and
    # mask_ratio is ignored.
    B, C, H, W = y.shape
    hp, wp = H // patch, W // patch
    patches = y.reshape(B, C, hp, patch, wp, patch)
    patches = patches.transpose(0, 2, 4, 1, 3, 5).reshape(B, hp * wp, C * patch * patch)
    tokens = jnp.einsum("bnp,pd->bnd", patches, w_embed)
    cls = jnp.broadcast_to(cls_token, (B, 1, w_embed.shape[1]))
    latent = jnp.concatenate([cls, tokens], axis=1)   # [B, 1+N, D]
    return latent, None, None


# ---------------------------------------------------------------------------
# Full BarlowTwins forward
# ---------------------------------------------------------------------------
def barlow_twins_forward(y1, y2, params, *, lambd, mask_ratio,
                         latent_mode="cls", compute_dtype=jnp.float32):
    cfg = _tpu_config()
    latent1, _, _ = backbone_forward(y1, params["w_embed"], params["cls_token"],
                                     mask_ratio=0.0)
    latent2, _, _ = backbone_forward(y2, params["w_embed"], params["cls_token"],
                                     mask_ratio=mask_ratio)
    if latent_mode == "cls":
        lat1, lat2 = latent1[:, 0], latent2[:, 0]
    else:
        lat1 = jnp.mean(latent1[:, 1:], axis=1)
        lat2 = jnp.mean(latent2[:, 1:], axis=1)

    z1n, z2n = run_projector(lat1, lat2, params, compute_dtype=compute_dtype, cfg=cfg)
    # TODO(synk): torch.distributed.all_reduce(c) is skipped (single-device path,
    # cfg.meta.distributed == False).
    return run_barlow_loss(z1n, z2n, lambd, cfg=cfg)


# ---------------------------------------------------------------------------
# Pure-JAX reference for verification
# ---------------------------------------------------------------------------
def _reference_loss(y1, y2, params, *, lambd, mask_ratio, latent_mode="cls"):
    latent1, _, _ = backbone_forward(y1, params["w_embed"], params["cls_token"])
    latent2, _, _ = backbone_forward(y2, params["w_embed"], params["cls_token"])
    lat1 = latent1[:, 0] if latent_mode == "cls" else jnp.mean(latent1[:, 1:], axis=1)
    lat2 = latent2[:, 0] if latent_mode == "cls" else jnp.mean(latent2[:, 1:], axis=1)

    def bn(h, g=None, b=None):
        mu = jnp.mean(h, axis=0, keepdims=True)
        var = jnp.mean((h - mu) ** 2, axis=0, keepdims=True)
        h = (h - mu) / jnp.sqrt(var + BN_EPS)
        if g is not None:
            h = h * g + b
        return h

    def proj(x):
        h = jnp.maximum(bn(x @ params["w1"], params["g1"], params["b1"]), 0.0)
        h = jnp.maximum(bn(h @ params["w2"], params["g2"], params["b2"]), 0.0)
        return h @ params["w3"]

    z1, z2 = proj(lat1), proj(lat2)
    c = bn(z1).T @ bn(z2) / z1.shape[0]
    diag = jnp.diagonal(c)
    on_diag = jnp.sum((diag - 1.0) ** 2)
    off_diag = jnp.sum(c ** 2) - jnp.sum(diag ** 2)
    return on_diag + lambd * off_diag


if __name__ == "__main__":
    # Small deterministic config: images [2, 4, 16, 16], patch 4 -> 16 tokens of
    # dim 64, embed dim 32, projection_sizes = [32, 64, 64, 32], lambd = 0.005.
    B, C, H, W = 2, 4, 16, 16
    patch = 4
    patch_dim = C * patch * patch
    D0, D1, D2, D3 = 32, 64, 64, 32
    lambd = 0.005
    mask_ratio = 0.75

    key = jax.random.PRNGKey(0)
    k_y1, k_y2, k_e, k_c, k_w1, k_w2, k_w3 = jax.random.split(key, 7)

    y1 = jax.random.normal(k_y1, (B, C, H, W), jnp.float32)
    y2 = jax.random.normal(k_y2, (B, C, H, W), jnp.float32)

    params = {
        "w_embed": jax.random.normal(k_e, (patch_dim, D0), jnp.float32) * 0.05,
        "cls_token": jax.random.normal(k_c, (1, 1, D0), jnp.float32) * 0.05,
        "w1": jax.random.normal(k_w1, (D0, D1), jnp.float32) * 0.1,
        "g1": jnp.ones((1, D1), jnp.float32),     # BatchNorm1d default init
        "b1": jnp.zeros((1, D1), jnp.float32),
        "w2": jax.random.normal(k_w2, (D1, D2), jnp.float32) * 0.1,
        "g2": jnp.ones((1, D2), jnp.float32),
        "b2": jnp.zeros((1, D2), jnp.float32),
        "w3": jax.random.normal(k_w3, (D2, D3), jnp.float32) * 0.1,
    }

    # fp32 path: exact check against the pure-JAX reference.
    loss_f32 = jax.block_until_ready(
        barlow_twins_forward(y1, y2, params, lambd=lambd, mask_ratio=mask_ratio,
                             latent_mode="cls", compute_dtype=jnp.float32))
    ref = jax.block_until_ready(
        _reference_loss(y1, y2, params, lambd=lambd, mask_ratio=mask_ratio))
    assert jnp.isfinite(loss_f32), "fp32 loss is not finite"
    assert jnp.allclose(loss_f32, ref, rtol=1e-4, atol=1e-4), (loss_f32, ref)

    # bf16 production path (bf16 MXU operands, fp32 stats / accumulation):
    # at this degenerate toy size (B=2) BN saturates to +/-1 so only a sanity
    # check is asserted here.
    loss_bf16 = jax.block_until_ready(
        barlow_twins_forward(y1, y2, params, lambd=lambd, mask_ratio=mask_ratio,
                             latent_mode="cls", compute_dtype=jnp.bfloat16))
    assert jnp.isfinite(loss_bf16), "bf16 loss is not finite"

    print("KERNEL_OK")
</pallas_src>

<mosaic_0001>
module attributes {stable_mosaic.version = 11 : i64} {
  func.func @_linear_bn_relu_kernel(%arg0: i32, %arg1: i32, %arg2: memref<4x32xf32, #tpu.memory_space<vmem>>, %arg3: memref<32x64xf32, #tpu.memory_space<vmem>>, %arg4: memref<1x64xf32, #tpu.memory_space<vmem>>, %arg5: memref<1x64xf32, #tpu.memory_space<vmem>>, %arg6: memref<4x64xf32, #tpu.memory_space<vmem>>, %arg7: memref<4x64xf32, #tpu.memory_space<vmem>>) attributes {dimension_semantics = [#tpu.dimension_semantics<parallel>, #tpu.dimension_semantics<arbitrary>], iteration_bounds = array<i64: 1, 1>, scalar_prefetch = 0 : i64, scratch_operands = 1 : i64, tpu.core_type = #tpu.core_type<tc>, window_params = [{transform_indices = @transform_0, window_bounds = array<i64: 4, 32>}, {transform_indices = @transform_1, window_bounds = array<i64: 32, 64>}, {transform_indices = @transform_2, window_bounds = array<i64: 1, 64>}, {transform_indices = @transform_3, window_bounds = array<i64: 1, 64>}, {transform_indices = @transform_4, window_bounds = array<i64: 4, 64>}]} {
    %c0_i32 = arith.constant 0 : i32
    %0 = arith.cmpi eq, %arg1, %c0_i32 : i32
    %1 = arith.extui %0 : i1 to i32
    %c0_i32_0 = arith.constant 0 : i32
    %2 = arith.cmpi ne, %1, %c0_i32_0 : i32
    scf.if %2 {
      %cst_10 = arith.constant 0.000000e+00 : f32
      %12 = vector.broadcast %cst_10 : f32 to vector<4x64xf32>
      %c0_11 = arith.constant 0 : index
      %c0_12 = arith.constant 0 : index
      %13 = vector.load %arg7[%c0_11, %c0_12] : memref<4x64xf32, #tpu.memory_space<vmem>>, vector<4x64xf32>
      tpu.vector_store %arg7[%c0_11, %c0_12], %12 {strides = array<i32>} : memref<4x64xf32, #tpu.memory_space<vmem>>, vector<4x64xf32>,
    } else {
    }
    %c0 = arith.constant 0 : index
    %c0_1 = arith.constant 0 : index
    %3 = vector.load %arg7[%c0, %c0_1] : memref<4x64xf32, #tpu.memory_space<vmem>>, vector<4x64xf32>
    %c0_2 = arith.constant 0 : index
    %c0_3 = arith.constant 0 : index
    %4 = vector.load %arg2[%c0_2, %c0_3] : memref<4x32xf32, #tpu.memory_space<vmem>>, vector<4x32xf32>
    %c0_4 = arith.constant 0 : index
    %c0_5 = arith.constant 0 : index
    %5 = vector.load %arg3[%c0_4, %c0_5] : memref<32x64xf32, #tpu.memory_space<vmem>>, vector<32x64xf32>
    %cst = arith.constant dense<0.000000e+00> : vector<4x64xf32>
    %6 = tpu.matmul %4, %5, %cst {dimension_numbers = #tpu.dot_dimension_numbers<[1], [0], [0], [1], [0, 0, 1, 1], [], []>} : vector<4x32xf32>, vector<32x64xf32>, vector<4x64xf32> -> vector<4x64xf32>
    %7 = arith.addf %3, %6 : vector<4x64xf32>
    %c0_6 = arith.constant 0 : index
    %c0_7 = arith.constant 0 : index
    %8 = vector.load %arg7[%c0_6, %c0_7] : memref<4x64xf32, #tpu.memory_space<vmem>>, vector<4x64xf32>
    tpu.vector_store %arg7[%c0_6, %c0_7], %7 {strides = array<i32>} : memref<4x64xf32, #tpu.memory_space<vmem>>, vector<4x64xf32>,
    %c0_i32_8 = arith.constant 0 : i32
    %9 = arith.cmpi eq, %arg1, %c0_i32_8 : i32
    %10 = arith.extui %9 : i1 to i32
    %c0_i32_9 = arith.constant 0 : i32
    %11 = arith.cmpi ne, %10, %c0_i32_9 : i32
    scf.if %11 {
      %c0_10 = arith.constant 0 : index
      %c0_11 = arith.constant 0 : index
      %12 = vector.load %arg4[%c0_10, %c0_11] : memref<1x64xf32, #tpu.memory_space<vmem>>, vector<1x64xf32>
      %c0_12 = arith.constant 0 : index
      %c0_13 = arith.constant 0 : index
      %13 = vector.load %arg5[%c0_12, %c0_13] : memref<1x64xf32, #tpu.memory_space<vmem>>, vector<1x64xf32>
      %c0_14 = arith.constant 0 : index
      %c0_15 = arith.constant 0 : index
      %14 = vector.load %arg7[%c0_14, %c0_15] : memref<4x64xf32, #tpu.memory_space<vmem>>, vector<2x64xf32>
      %cst_16 = arith.constant dense<0.000000e+00> : vector<64xf32>
      %15 = vector.multi_reduction <add>, %14, %cst_16 [0] : vector<2x64xf32> to vector<64xf32>
      %16 = vector.shape_cast %15 : vector<64xf32> to vector<1x64xf32>
      %cst_17 = arith.constant 5.000000e-01 : f32
      %17 = vector.broadcast %cst_17 : f32 to vector<1x64xf32>
      %18 = arith.mulf %16, %17 : vector<1x64xf32>
      %19 = arith.mulf %14, %14 : vector<2x64xf32>
      %cst_18 = arith.constant dense<0.000000e+00> : vector<64xf32>
      %20 = vector.multi_reduction <add>, %19, %cst_18 [0] : vector<2x64xf32> to vector<64xf32>
      %21 = vector.shape_cast %20 : vector<64xf32> to vector<1x64xf32>
      %cst_19 = arith.constant 5.000000e-01 : f32
      %22 = vector.broadcast %cst_19 : f32 to vector<1x64xf32>
      %23 = arith.mulf %21, %22 : vector<1x64xf32>
      %24 = arith.mulf %18, %18 : vector<1x64xf32>
      %25 = arith.subf %23, %24 : vector<1x64xf32>
      %cst_20 = arith.constant 0.000000e+00 : f32
      %26 = vector.broadcast %cst_20 : f32 to vector<1x64xf32>
      %27 = arith.maximumf %25, %26 : vector<1x64xf32>
      %cst_21 = arith.constant 9.99999974E-6 : f32
      %28 = vector.broadcast %cst_21 : f32 to vector<1x64xf32>
      %29 = arith.addf %27, %28 : vector<1x64xf32>
      %30 = math.rsqrt %29 : vector<1x64xf32>
      %31 = arith.mulf %12, %30 : vector<1x64xf32>
      %32 = arith.mulf %18, %31 : vector<1x64xf32>
      %33 = arith.subf %13, %32 : vector<1x64xf32>
      %34 = vector.broadcast %31 : vector<1x64xf32> to vector<2x64xf32>
      %35 = arith.mulf %14, %34 : vector<2x64xf32>
      %36 = vector.broadcast %33 : vector<1x64xf32> to vector<2x64xf32>
      %37 = arith.addf %35, %36 : vector<2x64xf32>
      %cst_22 = arith.constant 0.000000e+00 : f32
      %38 = vector.broadcast %cst_22 : f32 to vector<2x64xf32>
      %39 = arith.maximumf %37, %38 : vector<2x64xf32>
      %c0_23 = arith.constant 0 : index
      %c0_24 = arith.constant 0 : index
      %40 = vector.load %arg6[%c0_23, %c0_24] : memref<4x64xf32, #tpu.memory_space<vmem>>, vector<2x64xf32>
      tpu.vector_store %arg6[%c0_23, %c0_24], %39 {strides = array<i32>} : memref<4x64xf32, #tpu.memory_space<vmem>>, vector<2x64xf32>,
      %c2 = arith.constant 2 : index
      %c0_25 = arith.constant 0 : index
      %41 = vector.load %arg7[%c2, %c0_25] : memref<4x64xf32, #tpu.memory_space<vmem>>, vector<2x64xf32>
      %cst_26 = arith.constant dense<0.000000e+00> : vector<64xf32>
      %42 = vector.multi_reduction <add>, %41, %cst_26 [0] : vector<2x64xf32> to vector<64xf32>
      %43 = vector.shape_cast %42 : vector<64xf32> to vector<1x64xf32>
      %cst_27 = arith.constant 5.000000e-01 : f32
      %44 = vector.broadcast %cst_27 : f32 to vector<1x64xf32>
      %45 = arith.mulf %43, %44 : vector<1x64xf32>
      %46 = arith.mulf %41, %41 : vector<2x64xf32>
      %cst_28 = arith.constant dense<0.000000e+00> : vector<64xf32>
      %47 = vector.multi_reduction <add>, %46, %cst_28 [0] : vector<2x64xf32> to vector<64xf32>
      %48 = vector.shape_cast %47 : vector<64xf32> to vector<1x64xf32>
      %cst_29 = arith.constant 5.000000e-01 : f32
      %49 = vector.broadcast %cst_29 : f32 to vector<1x64xf32>
      %50 = arith.mulf %48, %49 : vector<1x64xf32>
      %51 = arith.mulf %45, %45 : vector<1x64xf32>
      %52 = arith.subf %50, %51 : vector<1x64xf32>
      %cst_30 = arith.constant 0.000000e+00 : f32
      %53 = vector.broadcast %cst_30 : f32 to vector<1x64xf32>
      %54 = arith.maximumf %52, %53 : vector<1x64xf32>
      %cst_31 = arith.constant 9.99999974E-6 : f32
      %55 = vector.broadcast %cst_31 : f32 to vector<1x64xf32>
      %56 = arith.addf %54, %55 : vector<1x64xf32>
      %57 = math.rsqrt %56 : vector<1x64xf32>
      %58 = arith.mulf %12, %57 : vector<1x64xf32>
      %59 = arith.mulf %45, %58 : vector<1x64xf32>
      %60 = arith.subf %13, %59 : vector<1x64xf32>
      %61 = vector.broadcast %58 : vector<1x64xf32> to vector<2x64xf32>
      %62 = arith.mulf %41, %61 : vector<2x64xf32>
      %63 = vector.broadcast %60 : vector<1x64xf32> to vector<2x64xf32>
      %64 = arith.addf %62, %63 : vector<2x64xf32>
      %cst_32 = arith.constant 0.000000e+00 : f32
      %65 = vector.broadcast %cst_32 : f32 to vector<2x64xf32>
      %66 = arith.maximumf %64, %65 : vector<2x64xf32>
      %c2_33 = arith.constant 2 : index
      %c0_34 = arith.constant 0 : index
      %67 = vector.load %arg6[%c2_33, %c0_34] : memref<4x64xf32, #tpu.memory_space<vmem>>, vector<2x64xf32>
      tpu.vector_store %arg6[%c2_33, %c0_34], %66 {strides = array<i32>} : memref<4x64xf32, #tpu.memory_space<vmem>>, vector<2x64xf32>,
    } else {
    }
    return
  }
  func.func @transform_0(%arg0: i32, %arg1: i32) -> (i32, i32) {
    %c0_i32 = arith.constant 0 : i32
    %c0_i32_0 = arith.constant 0 : i32
    return %c0_i32, %arg1 : i32, i32
  }
  func.func @transform_1(%arg0: i32, %arg1: i32) -> (i32, i32) {
    %c0_i32 = arith.constant 0 : i32
    return %arg1, %arg0 : i32, i32
  }
  func.func @transform_2(%arg0: i32, %arg1: i32) -> (i32, i32) {
    %c0_i32 = arith.constant 0 : i32
    %c0_i32_0 = arith.constant 0 : i32
    return %c0_i32, %arg0 : i32, i32
  }
  func.func @transform_3(%arg0: i32, %arg1: i32) -> (i32, i32) {
    %c0_i32 = arith.constant 0 : i32
    %c0_i32_0 = arith.constant 0 : i32
    return %c0_i32, %arg0 : i32, i32
  }
  func.func @transform_4(%arg0: i32, %arg1: i32) -> (i32, i32) {
    %c0_i32 = arith.constant 0 : i32
    %c0_i32_0 = arith.constant 0 : i32
    return %c0_i32, %arg0 : i32, i32
  }
}

</mosaic_0001>

<bundles_post_ra>
// kernel: tpu_custom_call.1
= control target key start
LH: loop header
LB: loop body
LE: loop exit
PB: predicated region body
PF: predicated region fallthrough
CT: control target
= control target key end

     0   :  { %9 = vsyncpa [#allocation4], 0  ;;  %s436_s0 = inlined_call_operand.hbm [shape: f32[4,32], index: 0, kind: input, shape index: {}]   ;;  %s437_s1 = inlined_call_operand.hbm [shape: f32[32,64], index: 1, kind: input, shape index: {}]   ;;  %s438_s2 = inlined_call_operand.vmem [shape: f32[1,64], index: 2, kind: input, shape index: {}]   ;;  %s439_s3 = inlined_call_operand.vmem [shape: f32[1,64], index: 3, kind: input, shape index: {}]   ;;  %s440_s4 = inlined_call_operand.hbm [shape: f32[4,64], index: 4, kind: output, shape index: {}]  }
   0x1   :  { %10 = vsyncpa [#allocation7], 0 }
   0x2   :  { %11 = vsyncpa [#allocation5], 0  ;;  %s346_s15 = smov [#allocation3]   ;;  %s347_s17 = smov [#allocation6]  }
   0x3   :  { %s18_s16 = sshll.u32 %s346_s15, 4  ;;  %s27_s18 = sshll.u32 %s347_s17, 4  ;;  %s19_s16 = int_to_ptr.vmem [resolvable:$true] %s18_s16  ;;  %s379_s18 = int_to_ptr.vmem [resolvable:$true] %s27_s18 }
   0x4   :  { %s274_s21 = scalar_lea.hbm %s436_s0, 64 }
   0x5   :  { %p275_p0 = scmp.ne.s32.totalorder %s436_s0, %s274_s21  ;;  %p278_p1 = scmp.lt.u32.totalorder %s274_s21, %s436_s0 }
   0x7   :  { %p280_p2 = pnand %p278_p1, %p275_p0 }
   0x9   :  { %283 = shalt.err (!%p280_p2)
}
   0xa   :  { %s284_s26 = scalar_lea.vmem %s19_s16, 64  ;;  %p289_p4 = scmp.lt.s32.totalorder %s19_s16, %s19_s16 }
   0xb   :  { %p285_p3 = scmp.ne.s32.totalorder %s19_s16, %s284_s26  ;;  %p290_p5 = scmp.lt.s32.totalorder %s284_s26, %s284_s26 }
   0xd   :  { %p291_p6 = por %p290_p5, %p289_p4 }
   0xf   :  { %p292_p7 = pnand %p291_p6, %p285_p3 }
  0x11   :  { %295 = shalt.err (!%p292_p7)
}
  0x12   :  { %21 = dma.hbm_to_vmem [thread:$0]  %s436_s0, 64, %s19_s16, [#allocation4]  }
  0x13   :  { %s296_s5 = scalar_lea.hbm %s437_s1, 512 }
  0x14   :  { %p297_p8 = scmp.ne.s32.totalorder %s437_s1, %s296_s5  ;;  %p300_p9 = scmp.lt.u32.totalorder %s296_s5, %s437_s1 }
  0x16   :  { %p302_p10 = pnand %p300_p9, %p297_p8 }
  0x18   :  { %305 = shalt.err (!%p302_p10)
}
  0x19   :  { %s306_s10 = scalar_lea.vmem %s379_s18, 512  ;;  %p311_p12 = scmp.lt.s32.totalorder %s379_s18, %s379_s18 }
  0x1a   :  { %p307_p11 = scmp.ne.s32.totalorder %s379_s18, %s306_s10  ;;  %p312_p13 = scmp.lt.s32.totalorder %s306_s10, %s306_s10 }
  0x1c   :  { %p313_p0 = por %p312_p13, %p311_p12 }
  0x1e   :  { %p314_p1 = pnand %p313_p0, %p307_p11 }
  0x20   :  { %317 = shalt.err (!%p314_p1)
}
  0x21   :  { %s348_s0 = smov 128   ;;  %s349_s11 = smov 8  }
  0x22   :  { %33 = dma.hbm_to_vmem [thread:$0]  %s437_s1, 512, %s379_s18, [#allocation7], %s348_s0, %s348_s0, %s349_s11  }
  0x23   :  { %340 = dma.done.wait [#allocation4], 64  }
  0x24   :  { %341 = vsyncadd [#allocation4], 4294967232 }
  0x25   :  { %342 = dma.done.wait [#allocation7], 512  }
  0x26   :  { %343 = vsyncadd [#allocation7], 4294966784  ;;  %vm48_vm0 = vcmask 519168   ;;  %v350_v0 = vmov 0.0|0.0   ;;  %v351_v1 = vmov 0.0   ;;  %vm352_vm1 = vmmov 0  }
  0x27   :  { %256 = vmatprep.subr.bf16.mxu0 %v350_v0  ;;  %49 = vst.msk [vmem:[#allocation2] sm:$0xf] %vm48_vm0, %v351_v1  ;;  %253 = vmatprep.mubr.msk.f32.mxu0 %vm352_vm1, %v351_v1  ;;  %v52_v2 = vld [vmem:[#allocation6] sm:$0xff]  ;;  %v53_v3 = vld [vmem:[#allocation6 + $0x8] sm:$0xff]  ;;  %v54_v4 = vld [vmem:[#allocation6 + $0x10] sm:$0xff]  ;;  %vm56_vm2 = vcmask 261120   ;;  %v166_v57 = vlaneseq }
  0x28   :  { %v257_v5 = vpack.c.bf16 %v53_v3, %v52_v2  ;;  %v55_v6 = vld [vmem:[#allocation6 + $0x18] sm:$0xff]  ;;  %vm139_vm3 = vcmask 517120  }
  0x29   :  { %v260_v7 = vpack.c.bf16 %v55_v6, %v54_v4  ;;  %v51_v8 = vld [vmem:[#allocation3] sm:$0xf]  ;;  %v167_v58 = vshrl.u32 %v166_v57, 7  ;;  %v136_v59 = vld [vmem:[%s438_s2] sm:$0x1]  ;;  %s353_s2 = smov [#allocation8]  }
  0x2a   :  { %258 = vmatpush3.bf16.msra.mxu0 %v257_v5  ;;  %s229_s17 = sshll.u32 %s353_s2, 4  ;;  %s230_s17 = int_to_ptr.vmem [resolvable:$true] %s229_s17 }
  0x2b   :  { %259 = vmatprep.subr.bf16.mxu0 %v350_v0  ;;  %v168_v60 = vsub.s32 0, %v167_v58  ;;  %v137_v0 = vld [vmem:[%s439_s3] sm:$0x1]  ;;  %s318_s3 = scalar_lea.vmem %s230_s17, 64  ;;  %p323_p3 = scmp.lt.s32.totalorder %s230_s17, %s230_s17 }
  0x2c   :  { %p319_p2 = scmp.ne.s32.totalorder %s230_s17, %s318_s3  ;;  %p324_p4 = scmp.lt.s32.totalorder %s318_s3, %s318_s3 }
  0x2e   :  { %261 = vmatpush3.bf16.msra.mxu0 %v260_v7  ;;  %v50_v9 = vld [vmem:[#allocation2] sm:$0xf]  ;;  %p325_p5 = por %p324_p4, %p323_p3 }
  0x30   :  { %p326_p6 = pnand %p325_p5, %p319_p2 }
  0x31   :  { %254 = vmatmul.mubr.msk.f32.vlgmr.msra.gmra.mrb[0].mxu0 %vm56_vm2, %v51_v8 }
 0x104   :  { %v126_v10 = vpop.f32.mrb[0].mxu0 }
 0x105   :  { %v130_v11 = vadd.f32 %v126_v10, %v50_v9  ;;  %v255_v12 = vpop.f32.mrb[1].mxu0 }
 0x107   :  { %132 = vst.msk [vmem:[#allocation2] sm:$0xf] %vm48_vm0, %v130_v11 }
 0x10e   :  { %v138_v13 = vld [vmem:[#allocation2] sm:$0x3]  ;;  %v181_v14 = vld [vmem:[#allocation2 + $0x2] sm:$0x3] }
 0x10f   :  { %v140_v15 = vsel %vm139_vm3, %v138_v13, 0.0  ;;  %v148_v16 = vmul.f32 %v138_v13, %v138_v13  ;;  %v182_v17 = vsel %vm139_vm3, %v181_v14, 0.0  ;;  %v190_v18 = vmul.f32 %v181_v14, %v181_v14 }
 0x110   :  { %v141_v19 = vrot.slane %v140_v15, 4  ;;  %v183_v20 = vrot.slane %v182_v17, 4 }
 0x111   :  { %v149_v21 = vsel %vm139_vm3, %v148_v16, 0.0  ;;  %v191_v22 = vsel %vm139_vm3, %v190_v18, 0.0 }
 0x112   :  { %v142_v23 = vadd.f32 %v141_v19, %v140_v15  ;;  %v150_v24 = vrot.slane %v149_v21, 4  ;;  %v184_v25 = vadd.f32 %v183_v20, %v182_v17  ;;  %v192_v26 = vrot.slane %v191_v22, 4 }
 0x114   :  { %v143_v27 = vrot.slane %v142_v23, 2  ;;  %v151_v28 = vadd.f32 %v150_v24, %v149_v21  ;;  %v185_v29 = vrot.slane %v184_v25, 2  ;;  %v193_v30 = vadd.f32 %v192_v26, %v191_v22 }
 0x116   :  { %v144_v31 = vadd.f32 %v143_v27, %v142_v23  ;;  %v152_v32 = vrot.slane %v151_v28, 2  ;;  %v186_v33 = vadd.f32 %v185_v29, %v184_v25  ;;  %v194_v34 = vrot.slane %v193_v30, 2 }
 0x118   :  { %v145_v35 = vrot.slane %v144_v31, 1  ;;  %v153_v36 = vadd.f32 %v152_v32, %v151_v28  ;;  %v187_v37 = vrot.slane %v186_v33, 1  ;;  %v195_v38 = vadd.f32 %v194_v34, %v193_v30 }
 0x11a   :  { %v146_v39 = vadd.f32 %v145_v35, %v144_v31  ;;  %v154_v40 = vrot.slane %v153_v36, 1  ;;  %v188_v41 = vadd.f32 %v187_v37, %v186_v33  ;;  %v196_v42 = vrot.slane %v195_v38, 1 }
 0x11c   :  { %v147_v43 = vmul.f32 0.5, %v146_v39  ;;  %v155_v44 = vadd.f32 %v154_v40, %v153_v36  ;;  %v189_v45 = vmul.f32 0.5, %v188_v41  ;;  %v197_v46 = vadd.f32 %v196_v42, %v195_v38 }
 0x11e   :  { %v156_v47 = vmul.f32 0.5, %v155_v44  ;;  %v157_v48 = vmul.f32 %v147_v43, %v147_v43  ;;  %v198_v49 = vmul.f32 0.5, %v197_v46  ;;  %v199_v50 = vmul.f32 %v189_v45, %v189_v45 }
 0x120   :  { %v158_v51 = vsub.f32 %v156_v47, %v157_v48  ;;  %v200_v52 = vsub.f32 %v198_v49, %v199_v50 }
 0x122   :  { %v159_v53 = vmax.f32 %v158_v51, 0.0  ;;  %v201_v54 = vmax.f32 %v200_v52, 0.0 }
 0x124   :  { %v160_v55 = vadd.f32 1e-05, %v159_v53  ;;  %v202_v56 = vadd.f32 1e-05, %v201_v54 }
 0x126   :  { %270 = vrsqrt.f32 %v160_v55 }
 0x127   :  { %272 = vrsqrt.f32 %v202_v56 }
 0x130   :  { %v271_v61 = vpop.eup %270 }
 0x131   :  { %v273_v62 = vpop.eup %272  ;;  %v162_v63 = vmul.f32 %v271_v61, %v136_v59 }
 0x132   :  { %v204_v1 = vmul.f32 %v273_v62, %v136_v59 }
 0x133   :  { %v163_v2 = vmul.f32 %v162_v63, %v147_v43  ;;  %v169_v3 = vrot.slane %v162_v63, %v168_v60 }
 0x134   :  { %v205_v4 = vmul.f32 %v204_v1, %v189_v45  ;;  %v211_v5 = vrot.slane %v204_v1, %v168_v60 }
 0x135   :  { %v164_v6 = vsub.f32 %v137_v0, %v163_v2  ;;  %v171_v8 = vmul.f32 %v169_v3, %v138_v13 }
 0x136   :  { %v206_v7 = vsub.f32 %v137_v0, %v205_v4  ;;  %v213_v10 = vmul.f32 %v211_v5, %v181_v14 }
 0x137   :  { %v176_v9 = vrot.slane %v164_v6, %v168_v60 }
 0x138   :  { %v218_v11 = vrot.slane %v206_v7, %v168_v60 }
 0x139   :  { %v178_v12 = vadd.f32 %v176_v9, %v171_v8 }
 0x13a   :  { %v220_v15 = vadd.f32 %v218_v11, %v213_v10 }
 0x13b   :  { %v179_v16 = vmax.f32 %v178_v12, 0.0 }
 0x13c   :  { %v221_v17 = vmax.f32 %v220_v15, 0.0 }
 0x13d   :  { %180 = vst.msk [vmem:[#allocation8] sm:$0x3] %vm139_vm3, %v179_v16 }
 0x13e   :  { %222 = vst.msk [vmem:[#allocation8 + $0x2] sm:$0x3] %vm139_vm3, %v221_v17 }
 0x13f   :  { %329 = shalt.err (!%p326_p6)
}
 0x140   :  { %s330_s20 = scalar_lea.hbm %s440_s4, 64 }
 0x141   :  { %p331_p7 = scmp.ne.s32.totalorder %s440_s4, %s330_s20  ;;  %p334_p8 = scmp.lt.u32.totalorder %s330_s20, %s440_s4 }
 0x143   :  { %p336_p9 = pnand %p334_p8, %p331_p7 }
 0x145   :  { %339 = shalt.err (!%p336_p9)
}
 0x146   :  { %232 = dma.vmem_to_hbm [thread:$0]  %s230_s17, 64, %s440_s4, [#allocation5]  }
 0x147   :  { %344 = dma.done.wait [#allocation5], 64  }
 0x148   :  { %345 = vsyncadd [#allocation5], 4294967232 }
 0x149   :  { %236 = vsyncpa [#allocation4], 1 }
 0x14a   :  { %237 = vsyncpa [#allocation7], 1 }
 0x14b   :  { %238 = vsyncpa [#allocation5], 1 }

</bundles_post_ra>
